<compile_context>
chip_gen: v7x
topology: tpu7x:2x2x1
jax: 0.10.0
libtpu: 0.0.40
codegen_flags: <defaults>
</compile_context>

<pallas_src>
import jax
import jax.numpy as jnp
from jax.experimental import pallas as pl
from jax.experimental.pallas import tpu as pltpu

# Model hyper-parameters (from hparams in the reference script).
EMBEDDING_SIZES = [(7, 16), (2, 16)]
EMB_DIM = 16
N_CAT = len(EMBEDDING_SIZES)
N_CONT = 4                                    # ['value', 'hour_min', 'gap_holiday', 't']
IN_DIM = sum(e for _, e in EMBEDDING_SIZES) + N_CONT     # 36
IN_DIM_PAD = 64                               # first-layer input padded to 64 lanes
LAYER_DIMS = [IN_DIM, 64, 128, 256, 128, 64]
LATENT_DIM = 16
HEAD_DIM = 2 * LATENT_DIM                     # fused mu | logvar
N_LAYERS = len(LAYER_DIMS) - 1
LEAKY_SLOPE = 0.1
BN_EPS = 1e-5
BIAS_ROWS = 8                                 # (8,128)-aligned bias pack
BIAS_COLS = 256
N_IN_COLS = 8                                 # packed [cat0, cat1, cont(4), pad(2)]
ONEHOT_K = 16                                 # 7 + 2 categories, padded to 16
EMB_TBL_COLS = 128                            # [hi|mid|lo] chunks (3*32) padded to 128
OUT_COLS = 128                                # lane-dense fused output slab
HEAD_OFF = 64                                 # head lives in slab cols 64:96
TB_MAX = 2048                                 # batch tile (rows per grid step)


def _encoder_kernel(xin_ref, emb_ref, w0_ref, w1_ref, w2_ref, w3_ref, w4_ref,
                    wh_ref, bias_ref, out_ref):
    """One batch tile: one-hot MXU gather + 5 fused layers + fused head, one 128-lane store."""
    tb = xin_ref.shape[0]
    xin = xin_ref[...]                                    # (tb, 8) f32
    bias = bias_ref[...]                                  # (8, 256) f32

    # ---- embedding lookup as a one-hot MXU matmul (exact f32 via 3 bf16 chunks) ----
    cat0 = xin[:, 0:1].astype(jnp.int32)                  # (tb, 1)
    cat1 = xin[:, 1:2].astype(jnp.int32)
    xc = xin[:, N_CAT:N_CAT + N_CONT]                     # (tb, 4) f32
    col = jax.lax.broadcasted_iota(jnp.int32, (tb, ONEHOT_K), 1)
    target = jnp.where(col < EMBEDDING_SIZES[0][0], cat0,
                       cat1 + EMBEDDING_SIZES[0][0])
    onehot = (col == target).astype(jnp.bfloat16)         # (tb, 16), exact 0/1
    d = jnp.dot(onehot, emb_ref[...],
                preferred_element_type=jnp.float32)        # (tb, 128)
    e01 = (d[:, 0:2 * EMB_DIM]
           + d[:, 2 * EMB_DIM:4 * EMB_DIM]
           + d[:, 4 * EMB_DIM:6 * EMB_DIM])                # (tb, 32) exact f32 [e0|e1]

    # ---- MLP input as a 64-lane slab [e0|e1|cont|0...] (matches zero-padded W0) ----
    x64 = jnp.concatenate(
        [e01, xc, jnp.zeros((tb, IN_DIM_PAD - IN_DIM), jnp.float32)], axis=1)

    # ---- 5 x (Linear with folded BN + LeakyReLU(0.1)), bf16 MXU / f32 acts ----
    h = x64
    w_refs = (w0_ref, w1_ref, w2_ref, w3_ref, w4_ref)
    for i in range(N_LAYERS):
        dout = LAYER_DIMS[i + 1]
        z = jnp.dot(h.astype(jnp.bfloat16), w_refs[i][...],
                    preferred_element_type=jnp.float32)
        z = z + bias[i:i + 1, 0:dout]
        h = jnp.where(z >= 0, z, LEAKY_SLOPE * z)

    # ---- fused mu | logvar head (kept in f32; computationally free) ----
    head = (jnp.dot(h, wh_ref[...], preferred_element_type=jnp.float32)
            + bias[N_LAYERS:N_LAYERS + 1, 0:HEAD_DIM])

    # ---- single lane-dense store: [x(36) | 0(28) | mu,logvar(32) | 0(32)] ----
    out_ref[...] = jnp.concatenate(
        [x64, head, jnp.zeros((tb, OUT_COLS - HEAD_OFF - HEAD_DIM), jnp.float32)],
        axis=1)


def init_params(key):
    """Deterministic synthetic parameters with the PyTorch module's shapes."""
    keys = iter(jax.random.split(key, 64))
    params = {}
    params["emb"] = [
        jax.random.normal(next(keys), (n_cats, emb), jnp.float32) * 0.1
        for n_cats, emb in EMBEDDING_SIZES
    ]
    layers = []
    for i in range(N_LAYERS):
        din, dout = LAYER_DIMS[i], LAYER_DIMS[i + 1]
        layers.append(dict(
            w=jax.random.normal(next(keys), (din, dout), jnp.float32) / jnp.sqrt(din),
            b=jax.random.normal(next(keys), (dout,), jnp.float32) * 0.01,
            gamma=1.0 + 0.05 * jax.random.normal(next(keys), (dout,), jnp.float32),
            beta=0.05 * jax.random.normal(next(keys), (dout,), jnp.float32),
            rmean=0.05 * jax.random.normal(next(keys), (dout,), jnp.float32),
            rvar=1.0 + 0.1 * jnp.abs(jax.random.normal(next(keys), (dout,), jnp.float32)),
        ))
    params["layers"] = layers
    dl = LAYER_DIMS[-1]
    params["wmu"] = jax.random.normal(next(keys), (dl, LATENT_DIM), jnp.float32) / jnp.sqrt(dl)
    params["bmu"] = jax.random.normal(next(keys), (LATENT_DIM,), jnp.float32) * 0.01
    params["wlv"] = jax.random.normal(next(keys), (dl, LATENT_DIM), jnp.float32) / jnp.sqrt(dl)
    params["blv"] = jax.random.normal(next(keys), (LATENT_DIM,), jnp.float32) * 0.01
    return params


def fold_params(params):
    """Fold eval-mode BN into the Linear, fuse mu/logvar heads, pack biases/tables."""
    weights = []
    bias_pack = jnp.zeros((BIAS_ROWS, BIAS_COLS), jnp.float32)
    for i, lyr in enumerate(params["layers"]):
        scale = lyr["gamma"] / jnp.sqrt(lyr["rvar"] + BN_EPS)
        shift = lyr["beta"] - lyr["rmean"] * scale
        w_fold = lyr["w"] * scale[None, :]
        b_fold = lyr["b"] * scale + shift
        if i == 0:                                         # pad input dim 36 -> 64
            w_fold = jnp.pad(w_fold, ((0, IN_DIM_PAD - IN_DIM), (0, 0)))
        weights.append(w_fold.astype(jnp.bfloat16))        # bf16 MXU operands
        bias_pack = bias_pack.at[i, :b_fold.shape[0]].set(b_fold)
    w_head = jnp.concatenate([params["wmu"], params["wlv"]], axis=1)   # f32 (64, 32)
    b_head = jnp.concatenate([params["bmu"], params["blv"]], axis=0)
    bias_pack = bias_pack.at[N_LAYERS, :HEAD_DIM].set(b_head)

    # Block-diagonal embedding table [[E0, 0], [0, E1]] split into 3 exact bf16 chunks
    # (hi|mid|lo) so the one-hot MXU gather reproduces the f32 table bit-exactly.
    tbl = jnp.zeros((ONEHOT_K, 2 * EMB_DIM), jnp.float32)
    n0 = EMBEDDING_SIZES[0][0]
    n1 = EMBEDDING_SIZES[1][0]
    tbl = tbl.at[0:n0, 0:EMB_DIM].set(params["emb"][0])
    tbl = tbl.at[n0:n0 + n1, EMB_DIM:2 * EMB_DIM].set(params["emb"][1])
    hi = tbl.astype(jnp.bfloat16)
    r1 = tbl - hi.astype(jnp.float32)
    mid = r1.astype(jnp.bfloat16)
    r2 = r1 - mid.astype(jnp.float32)
    lo = r2.astype(jnp.bfloat16)
    emb_pack = jnp.zeros((ONEHOT_K, EMB_TBL_COLS), jnp.bfloat16)
    emb_pack = emb_pack.at[:, 0:2 * EMB_DIM].set(hi)
    emb_pack = emb_pack.at[:, 2 * EMB_DIM:4 * EMB_DIM].set(mid)
    emb_pack = emb_pack.at[:, 4 * EMB_DIM:6 * EMB_DIM].set(lo)

    return {
        "emb_pack": emb_pack,
        "weights": weights,
        "w_head": w_head,
        "bias_pack": bias_pack,
    }


def _round_up(n, m):
    return (n + m - 1) // m * m


@jax.jit
def encoder_forward(x_cont, x_cat, kparams):
    """Embedding + concat + MLP, single fused Pallas kernel over a batch grid."""
    B = x_cont.shape[0]

    # Pack categorical + continuous features into one (B, 8) f32 streaming input
    # (small int category ids are exact in f32).
    xin = jnp.concatenate(
        [x_cat.astype(jnp.float32), x_cont.astype(jnp.float32),
         jnp.zeros((B, N_IN_COLS - N_CAT - N_CONT), jnp.float32)], axis=1)

    b8 = _round_up(max(B, 1), 8)
    tb_cap = TB_MAX
    if b8 >= 16:   # guarantee >= 2 grid steps so both v7x TensorCores get work
        tb_cap = min(TB_MAX, _round_up(b8 // 2, 8))
    TB = min(tb_cap, b8)
    B_pad = _round_up(b8, TB)
    pad = B_pad - B
    if pad:
        xin = jnp.pad(xin, ((0, pad), (0, 0)))   # cat index 0 valid; rows sliced off

    def const_spec(shape):
        return pl.BlockSpec(shape, lambda i: (0, 0))

    in_specs = [pl.BlockSpec((TB, N_IN_COLS), lambda i: (i, 0)),   # packed inputs
                const_spec(kparams["emb_pack"].shape)]             # embedding table
    in_specs += [const_spec(w.shape) for w in kparams["weights"]]
    in_specs += [const_spec(kparams["w_head"].shape),
                 const_spec(kparams["bias_pack"].shape)]

    macs = ONEHOT_K * EMB_TBL_COLS
    macs += IN_DIM_PAD * LAYER_DIMS[1]
    macs += sum(LAYER_DIMS[i] * LAYER_DIMS[i + 1] for i in range(1, N_LAYERS))
    macs += LAYER_DIMS[-1] * HEAD_DIM
    param_bytes = (sum(int(w.size) * 2 for w in kparams["weights"])
                   + int(kparams["emb_pack"].size) * 2
                   + int(kparams["w_head"].size) * 4
                   + int(kparams["bias_pack"].size) * 4)
    cost = pl.CostEstimate(
        flops=2 * macs * B_pad,
        transcendentals=0,
        bytes_accessed=B_pad * 4 * (N_IN_COLS + OUT_COLS) + param_bytes,
    )

    slab = pl.pallas_call(
        _encoder_kernel,
        grid=(B_pad // TB,),
        in_specs=in_specs,
        out_specs=pl.BlockSpec((TB, OUT_COLS), lambda i: (i, 0)),
        out_shape=jax.ShapeDtypeStruct((B_pad, OUT_COLS), jnp.float32),
        compiler_params=pltpu.CompilerParams(
            dimension_semantics=("parallel",)),
        cost_estimate=cost,
    )(xin, kparams["emb_pack"], *kparams["weights"],
      kparams["w_head"], kparams["bias_pack"])

    x = slab[:B, :IN_DIM]
    mu = slab[:B, HEAD_OFF:HEAD_OFF + LATENT_DIM]
    logvar = slab[:B, HEAD_OFF + LATENT_DIM:HEAD_OFF + HEAD_DIM]
    return mu, logvar, x


if __name__ == "__main__":
    key = jax.random.PRNGKey(0)
    kp, kc, k0, k1 = jax.random.split(key, 4)

    params = init_params(kp)
    kparams = fold_params(params)

    batch = 8
    x_cont = jax.random.normal(kc, (batch, N_CONT), jnp.float32)
    x_cat = jnp.stack(
        [
            jax.random.randint(k0, (batch,), 0, EMBEDDING_SIZES[0][0], jnp.int32),
            jax.random.randint(k1, (batch,), 0, EMBEDDING_SIZES[1][0], jnp.int32),
        ],
        axis=1,
    )  # (B, 2) int32

    mu, logvar, x = encoder_forward(x_cont, x_cat, kparams)
    jax.block_until_ready((mu, logvar, x))

    assert mu.shape == (batch, LATENT_DIM)
    assert logvar.shape == (batch, LATENT_DIM)
    assert x.shape == (batch, IN_DIM)

    # Pure-JAX reference mirroring the kernel math (bf16 hidden layers, f32 head).
    x_exp = jnp.concatenate(
        [params["emb"][0][x_cat[:, 0]], params["emb"][1][x_cat[:, 1]], x_cont], axis=1)
    h = jnp.pad(x_exp, ((0, 0), (0, IN_DIM_PAD - IN_DIM)))
    for i in range(N_LAYERS):
        z = jnp.dot(h.astype(jnp.bfloat16), kparams["weights"][i],
                    preferred_element_type=jnp.float32)
        z = z + kparams["bias_pack"][i, :LAYER_DIMS[i + 1]]
        h = jnp.where(z >= 0, z, LEAKY_SLOPE * z)
    head_exp = (jnp.dot(h, kparams["w_head"], preferred_element_type=jnp.float32)
                + kparams["bias_pack"][N_LAYERS, :HEAD_DIM])
    assert jnp.allclose(x, x_exp, atol=1e-5, rtol=1e-5)
    assert jnp.allclose(mu, head_exp[:, :LATENT_DIM], atol=2e-2, rtol=2e-2)
    assert jnp.allclose(logvar, head_exp[:, LATENT_DIM:], atol=2e-2, rtol=2e-2)

    print("KERNEL_OK")
</pallas_src>

<mosaic_0001>
module attributes {stable_mosaic.version = 11 : i64} {
  func.func @_encoder_kernel(%arg0: i32, %arg1: memref<8x8xf32, #tpu.memory_space<vmem>>, %arg2: memref<16x128xbf16, #tpu.memory_space<vmem>>, %arg3: memref<64x64xbf16, #tpu.memory_space<vmem>>, %arg4: memref<64x128xbf16, #tpu.memory_space<vmem>>, %arg5: memref<128x256xbf16, #tpu.memory_space<vmem>>, %arg6: memref<256x128xbf16, #tpu.memory_space<vmem>>, %arg7: memref<128x64xbf16, #tpu.memory_space<vmem>>, %arg8: memref<64x32xf32, #tpu.memory_space<vmem>>, %arg9: memref<8x256xf32, #tpu.memory_space<vmem>>, %arg10: memref<8x128xf32, #tpu.memory_space<vmem>>) attributes {dimension_semantics = [#tpu.dimension_semantics<parallel>], iteration_bounds = array<i64: 1>, scalar_prefetch = 0 : i64, scratch_operands = 0 : i64, tpu.core_type = #tpu.core_type<tc>, window_params = [{transform_indices = @transform_0, window_bounds = array<i64: 8, 8>}, {pipeline_mode = #tpu.pipeline_mode<synchronous>, transform_indices = @transform_1, window_bounds = array<i64: 16, 128>}, {pipeline_mode = #tpu.pipeline_mode<synchronous>, transform_indices = @transform_2, window_bounds = array<i64: 64, 64>}, {pipeline_mode = #tpu.pipeline_mode<synchronous>, transform_indices = @transform_3, window_bounds = array<i64: 64, 128>}, {pipeline_mode = #tpu.pipeline_mode<synchronous>, transform_indices = @transform_4, window_bounds = array<i64: 128, 256>}, {pipeline_mode = #tpu.pipeline_mode<synchronous>, transform_indices = @transform_5, window_bounds = array<i64: 256, 128>}, {pipeline_mode = #tpu.pipeline_mode<synchronous>, transform_indices = @transform_6, window_bounds = array<i64: 128, 64>}, {pipeline_mode = #tpu.pipeline_mode<synchronous>, transform_indices = @transform_7, window_bounds = array<i64: 64, 32>}, {pipeline_mode = #tpu.pipeline_mode<synchronous>, transform_indices = @transform_8, window_bounds = array<i64: 8, 256>}, {transform_indices = @transform_9, window_bounds = array<i64: 8, 128>}]} {
    %c0 = arith.constant 0 : index
    %c0_0 = arith.constant 0 : index
    %0 = vector.load %arg1[%c0, %c0_0] : memref<8x8xf32, #tpu.memory_space<vmem>>, vector<8x8xf32>
    %c0_1 = arith.constant 0 : index
    %c0_2 = arith.constant 0 : index
    %1 = vector.load %arg9[%c0_1, %c0_2] : memref<8x256xf32, #tpu.memory_space<vmem>>, vector<8x256xf32>
    %2 = vector.extract_strided_slice %0 {offsets = [0, 0], sizes = [8, 1], strides = [1, 1]} : vector<8x8xf32> to vector<8x1xf32>
    %3 = arith.fptosi %2 : vector<8x1xf32> to vector<8x1xi32>
    %4 = vector.extract_strided_slice %0 {offsets = [0, 1], sizes = [8, 1], strides = [1, 1]} : vector<8x8xf32> to vector<8x1xf32>
    %5 = arith.fptosi %4 : vector<8x1xf32> to vector<8x1xi32>
    %6 = vector.extract_strided_slice %0 {offsets = [0, 2], sizes = [8, 4], strides = [1, 1]} : vector<8x8xf32> to vector<8x4xf32>
    %7 = tpu.iota {dimensions = array<i32: 1>} : vector<8x16xi32>
    %c7_i32 = arith.constant 7 : i32
    %8 = vector.broadcast %c7_i32 : i32 to vector<8x16xi32>
    %9 = arith.cmpi slt, %7, %8 : vector<8x16xi32>
    %c7_i32_3 = arith.constant 7 : i32
    %10 = vector.broadcast %c7_i32_3 : i32 to vector<8x1xi32>
    %11 = arith.addi %5, %10 : vector<8x1xi32>
    %12 = vector.shape_cast %3 : vector<8x1xi32> to vector<8x1xi32>
    %13 = vector.broadcast %12 : vector<8x1xi32> to vector<8x16xi32>
    %14 = vector.shape_cast %11 : vector<8x1xi32> to vector<8x1xi32>
    %15 = vector.broadcast %14 : vector<8x1xi32> to vector<8x16xi32>
    %16 = arith.select %9, %13, %15 : vector<8x16xi1>, vector<8x16xi32>
    %17 = arith.cmpi eq, %7, %16 : vector<8x16xi32>
    %18 = arith.extui %17 : vector<8x16xi1> to vector<8x16xi32>
    %19 = arith.sitofp %18 : vector<8x16xi32> to vector<8x16xf32>
    %20 = arith.truncf %19 : vector<8x16xf32> to vector<8x16xbf16>
    %c0_4 = arith.constant 0 : index
    %c0_5 = arith.constant 0 : index
    %21 = vector.load %arg2[%c0_4, %c0_5] : memref<16x128xbf16, #tpu.memory_space<vmem>>, vector<16x128xbf16>
    %cst = arith.constant dense<0.000000e+00> : vector<8x128xf32>
    %22 = tpu.matmul %20, %21, %cst {dimension_numbers = #tpu.dot_dimension_numbers<[1], [0], [0], [1], [0, 0, 1, 1], [], []>} : vector<8x16xbf16>, vector<16x128xbf16>, vector<8x128xf32> -> vector<8x128xf32>
    %23 = vector.extract_strided_slice %22 {offsets = [0, 0], sizes = [8, 32], strides = [1, 1]} : vector<8x128xf32> to vector<8x32xf32>
    %24 = vector.extract_strided_slice %22 {offsets = [0, 32], sizes = [8, 32], strides = [1, 1]} : vector<8x128xf32> to vector<8x32xf32>
    %25 = arith.addf %23, %24 : vector<8x32xf32>
    %26 = vector.extract_strided_slice %22 {offsets = [0, 64], sizes = [8, 32], strides = [1, 1]} : vector<8x128xf32> to vector<8x32xf32>
    %27 = arith.addf %25, %26 : vector<8x32xf32>
    %cst_6 = arith.constant 0.000000e+00 : f32
    %28 = vector.broadcast %cst_6 : f32 to vector<8x28xf32>
    %29 = tpu.concatenate %27, %6, %28 in 1 : vector<8x32xf32>, vector<8x4xf32>, vector<8x28xf32> -> vector<8x64xf32>
    %30 = arith.truncf %29 : vector<8x64xf32> to vector<8x64xbf16>
    %c0_7 = arith.constant 0 : index
    %c0_8 = arith.constant 0 : index
    %31 = vector.load %arg3[%c0_7, %c0_8] : memref<64x64xbf16, #tpu.memory_space<vmem>>, vector<64x64xbf16>
    %cst_9 = arith.constant dense<0.000000e+00> : vector<8x64xf32>
    %32 = tpu.matmul %30, %31, %cst_9 {dimension_numbers = #tpu.dot_dimension_numbers<[1], [0], [0], [1], [0, 0, 1, 1], [], []>} : vector<8x64xbf16>, vector<64x64xbf16>, vector<8x64xf32> -> vector<8x64xf32>
    %33 = vector.extract_strided_slice %1 {offsets = [0, 0], sizes = [1, 64], strides = [1, 1]} : vector<8x256xf32> to vector<1x64xf32>
    %34 = vector.broadcast %33 : vector<1x64xf32> to vector<8x64xf32>
    %35 = arith.addf %32, %34 : vector<8x64xf32>
    %cst_10 = arith.constant 0.000000e+00 : f32
    %36 = vector.broadcast %cst_10 : f32 to vector<8x64xf32>
    %37 = arith.cmpf oge, %35, %36 : vector<8x64xf32>
    %cst_11 = arith.constant 1.000000e-01 : f32
    %38 = vector.broadcast %cst_11 : f32 to vector<8x64xf32>
    %39 = arith.mulf %38, %35 : vector<8x64xf32>
    %40 = arith.select %37, %35, %39 : vector<8x64xi1>, vector<8x64xf32>
    %41 = arith.truncf %40 : vector<8x64xf32> to vector<8x64xbf16>
    %c0_12 = arith.constant 0 : index
    %c0_13 = arith.constant 0 : index
    %42 = vector.load %arg4[%c0_12, %c0_13] : memref<64x128xbf16, #tpu.memory_space<vmem>>, vector<64x128xbf16>
    %cst_14 = arith.constant dense<0.000000e+00> : vector<8x128xf32>
    %43 = tpu.matmul %41, %42, %cst_14 {dimension_numbers = #tpu.dot_dimension_numbers<[1], [0], [0], [1], [0, 0, 1, 1], [], []>} : vector<8x64xbf16>, vector<64x128xbf16>, vector<8x128xf32> -> vector<8x128xf32>
    %44 = vector.extract_strided_slice %1 {offsets = [1, 0], sizes = [1, 128], strides = [1, 1]} : vector<8x256xf32> to vector<1x128xf32>
    %45 = vector.broadcast %44 : vector<1x128xf32> to vector<8x128xf32>
    %46 = arith.addf %43, %45 : vector<8x128xf32>
    %cst_15 = arith.constant 0.000000e+00 : f32
    %47 = vector.broadcast %cst_15 : f32 to vector<8x128xf32>
    %48 = arith.cmpf oge, %46, %47 : vector<8x128xf32>
    %cst_16 = arith.constant 1.000000e-01 : f32
    %49 = vector.broadcast %cst_16 : f32 to vector<8x128xf32>
    %50 = arith.mulf %49, %46 : vector<8x128xf32>
    %51 = arith.select %48, %46, %50 : vector<8x128xi1>, vector<8x128xf32>
    %52 = arith.truncf %51 : vector<8x128xf32> to vector<8x128xbf16>
    %c0_17 = arith.constant 0 : index
    %c0_18 = arith.constant 0 : index
    %53 = vector.load %arg5[%c0_17, %c0_18] : memref<128x256xbf16, #tpu.memory_space<vmem>>, vector<128x256xbf16>
    %cst_19 = arith.constant dense<0.000000e+00> : vector<8x256xf32>
    %54 = tpu.matmul %52, %53, %cst_19 {dimension_numbers = #tpu.dot_dimension_numbers<[1], [0], [0], [1], [0, 0, 1, 1], [], []>} : vector<8x128xbf16>, vector<128x256xbf16>, vector<8x256xf32> -> vector<8x256xf32>
    %55 = vector.extract_strided_slice %1 {offsets = [2, 0], sizes = [1, 256], strides = [1, 1]} : vector<8x256xf32> to vector<1x256xf32>
    %56 = vector.broadcast %55 : vector<1x256xf32> to vector<8x256xf32>
    %57 = arith.addf %54, %56 : vector<8x256xf32>
    %cst_20 = arith.constant 0.000000e+00 : f32
    %58 = vector.broadcast %cst_20 : f32 to vector<8x256xf32>
    %59 = arith.cmpf oge, %57, %58 : vector<8x256xf32>
    %cst_21 = arith.constant 1.000000e-01 : f32
    %60 = vector.broadcast %cst_21 : f32 to vector<8x256xf32>
    %61 = arith.mulf %60, %57 : vector<8x256xf32>
    %62 = arith.select %59, %57, %61 : vector<8x256xi1>, vector<8x256xf32>
    %63 = arith.truncf %62 : vector<8x256xf32> to vector<8x256xbf16>
    %c0_22 = arith.constant 0 : index
    %c0_23 = arith.constant 0 : index
    %64 = vector.load %arg6[%c0_22, %c0_23] : memref<256x128xbf16, #tpu.memory_space<vmem>>, vector<256x128xbf16>
    %cst_24 = arith.constant dense<0.000000e+00> : vector<8x128xf32>
    %65 = tpu.matmul %63, %64, %cst_24 {dimension_numbers = #tpu.dot_dimension_numbers<[1], [0], [0], [1], [0, 0, 1, 1], [], []>} : vector<8x256xbf16>, vector<256x128xbf16>, vector<8x128xf32> -> vector<8x128xf32>
    %66 = vector.extract_strided_slice %1 {offsets = [3, 0], sizes = [1, 128], strides = [1, 1]} : vector<8x256xf32> to vector<1x128xf32>
    %67 = vector.broadcast %66 : vector<1x128xf32> to vector<8x128xf32>
    %68 = arith.addf %65, %67 : vector<8x128xf32>
    %cst_25 = arith.constant 0.000000e+00 : f32
    %69 = vector.broadcast %cst_25 : f32 to vector<8x128xf32>
    %70 = arith.cmpf oge, %68, %69 : vector<8x128xf32>
    %cst_26 = arith.constant 1.000000e-01 : f32
    %71 = vector.broadcast %cst_26 : f32 to vector<8x128xf32>
    %72 = arith.mulf %71, %68 : vector<8x128xf32>
    %73 = arith.select %70, %68, %72 : vector<8x128xi1>, vector<8x128xf32>
    %74 = arith.truncf %73 : vector<8x128xf32> to vector<8x128xbf16>
    %c0_27 = arith.constant 0 : index
    %c0_28 = arith.constant 0 : index
    %75 = vector.load %arg7[%c0_27, %c0_28] : memref<128x64xbf16, #tpu.memory_space<vmem>>, vector<128x64xbf16>
    %cst_29 = arith.constant dense<0.000000e+00> : vector<8x64xf32>
    %76 = tpu.matmul %74, %75, %cst_29 {dimension_numbers = #tpu.dot_dimension_numbers<[1], [0], [0], [1], [0, 0, 1, 1], [], []>} : vector<8x128xbf16>, vector<128x64xbf16>, vector<8x64xf32> -> vector<8x64xf32>
    %77 = vector.extract_strided_slice %1 {offsets = [4, 0], sizes = [1, 64], strides = [1, 1]} : vector<8x256xf32> to vector<1x64xf32>
    %78 = vector.broadcast %77 : vector<1x64xf32> to vector<8x64xf32>
    %79 = arith.addf %76, %78 : vector<8x64xf32>
    %cst_30 = arith.constant 0.000000e+00 : f32
    %80 = vector.broadcast %cst_30 : f32 to vector<8x64xf32>
    %81 = arith.cmpf oge, %79, %80 : vector<8x64xf32>
    %cst_31 = arith.constant 1.000000e-01 : f32
    %82 = vector.broadcast %cst_31 : f32 to vector<8x64xf32>
    %83 = arith.mulf %82, %79 : vector<8x64xf32>
    %84 = arith.select %81, %79, %83 : vector<8x64xi1>, vector<8x64xf32>
    %c0_32 = arith.constant 0 : index
    %c0_33 = arith.constant 0 : index
    %85 = vector.load %arg8[%c0_32, %c0_33] : memref<64x32xf32, #tpu.memory_space<vmem>>, vector<64x32xf32>
    %cst_34 = arith.constant dense<0.000000e+00> : vector<8x32xf32>
    %86 = tpu.matmul %84, %85, %cst_34 {dimension_numbers = #tpu.dot_dimension_numbers<[1], [0], [0], [1], [0, 0, 1, 1], [], []>} : vector<8x64xf32>, vector<64x32xf32>, vector<8x32xf32> -> vector<8x32xf32>
    %87 = vector.extract_strided_slice %1 {offsets = [5, 0], sizes = [1, 32], strides = [1, 1]} : vector<8x256xf32> to vector<1x32xf32>
    %88 = vector.broadcast %87 : vector<1x32xf32> to vector<8x32xf32>
    %89 = arith.addf %86, %88 : vector<8x32xf32>
    %cst_35 = arith.constant 0.000000e+00 : f32
    %90 = vector.broadcast %cst_35 : f32 to vector<8x32xf32>
    %91 = tpu.concatenate %29, %89, %90 in 1 : vector<8x64xf32>, vector<8x32xf32>, vector<8x32xf32> -> vector<8x128xf32>
    %c0_36 = arith.constant 0 : index
    %c0_37 = arith.constant 0 : index
    %92 = vector.load %arg10[%c0_36, %c0_37] : memref<8x128xf32, #tpu.memory_space<vmem>>, vector<8x128xf32>
    tpu.vector_store %arg10[%c0_36, %c0_37], %91 {strides = array<i32>} : memref<8x128xf32, #tpu.memory_space<vmem>>, vector<8x128xf32>,
    return
  }
  func.func @transform_0(%arg0: i32) -> (i32, i32) {
    %c0_i32 = arith.constant 0 : i32
    %c0_i32_0 = arith.constant 0 : i32
    return %arg0, %c0_i32 : i32, i32
  }
  func.func @transform_1(%arg0: i32) -> (i32, i32) {
    %c0_i32 = arith.constant 0 : i32
    %c0_i32_0 = arith.constant 0 : i32
    %c0_i32_1 = arith.constant 0 : i32
    return %c0_i32, %c0_i32_0 : i32, i32
  }
  func.func @transform_2(%arg0: i32) -> (i32, i32) {
    %c0_i32 = arith.constant 0 : i32
    %c0_i32_0 = arith.constant 0 : i32
    %c0_i32_1 = arith.constant 0 : i32
    return %c0_i32, %c0_i32_0 : i32, i32
  }
  func.func @transform_3(%arg0: i32) -> (i32, i32) {
    %c0_i32 = arith.constant 0 : i32
    %c0_i32_0 = arith.constant 0 : i32
    %c0_i32_1 = arith.constant 0 : i32
    return %c0_i32, %c0_i32_0 : i32, i32
  }
  func.func @transform_4(%arg0: i32) -> (i32, i32) {
    %c0_i32 = arith.constant 0 : i32
    %c0_i32_0 = arith.constant 0 : i32
    %c0_i32_1 = arith.constant 0 : i32
    return %c0_i32, %c0_i32_0 : i32, i32
  }
  func.func @transform_5(%arg0: i32) -> (i32, i32) {
    %c0_i32 = arith.constant 0 : i32
    %c0_i32_0 = arith.constant 0 : i32
    %c0_i32_1 = arith.constant 0 : i32
    return %c0_i32, %c0_i32_0 : i32, i32
  }
  func.func @transform_6(%arg0: i32) -> (i32, i32) {
    %c0_i32 = arith.constant 0 : i32
    %c0_i32_0 = arith.constant 0 : i32
    %c0_i32_1 = arith.constant 0 : i32
    return %c0_i32, %c0_i32_0 : i32, i32
  }
  func.func @transform_7(%arg0: i32) -> (i32, i32) {
    %c0_i32 = arith.constant 0 : i32
    %c0_i32_0 = arith.constant 0 : i32
    %c0_i32_1 = arith.constant 0 : i32
    return %c0_i32, %c0_i32_0 : i32, i32
  }
  func.func @transform_8(%arg0: i32) -> (i32, i32) {
    %c0_i32 = arith.constant 0 : i32
    %c0_i32_0 = arith.constant 0 : i32
    %c0_i32_1 = arith.constant 0 : i32
    return %c0_i32, %c0_i32_0 : i32, i32
  }
  func.func @transform_9(%arg0: i32) -> (i32, i32) {
    %c0_i32 = arith.constant 0 : i32
    %c0_i32_0 = arith.constant 0 : i32
    return %arg0, %c0_i32 : i32, i32
  }
}

</mosaic_0001>

<bundles_post_ra>
// kernel: encoder_forward.1
= control target key start
LH: loop header
LB: loop body
LE: loop exit
PB: predicated region body
PF: predicated region fallthrough
CT: control target
= control target key end

     0   :  { %14 = vsyncpa [#allocation3], 0  ;;  %s1573_s0 = inlined_call_operand.vmem [shape: f32[8,8], index: 0, kind: input, shape index: {}]   ;;  %s1574_s1 = inlined_call_operand.hbm [shape: bf16[16,128], index: 1, kind: input, shape index: {}]   ;;  %s1575_s2 = inlined_call_operand.hbm [shape: bf16[64,64], index: 2, kind: input, shape index: {}]   ;;  %s1576_s3 = inlined_call_operand.hbm [shape: bf16[64,128], index: 3, kind: input, shape index: {}]   ;;  %s1577_s4 = inlined_call_operand.vmem [shape: bf16[128,256], index: 4, kind: input, shape index: {}]   ;;  %s1578_s5 = inlined_call_operand.vmem [shape: bf16[256,128], index: 5, kind: input, shape index: {}]   ;;  %s1579_s6 = inlined_call_operand.vmem [shape: bf16[128,64], index: 6, kind: input, shape index: {}]   ;;  %s1580_s7 = inlined_call_operand.vmem [shape: f32[64,32], index: 7, kind: input, shape index: {}]   ;;  %s1581_s8 = inlined_call_operand.hbm [shape: f32[8,256], index: 8, kind: input, shape index: {}]   ;;  %s1582_s9 = inlined_call_operand.vmem [shape: f32[8,128], index: 9, kind: output, shape index: {}]  }
   0x1   :  { %15 = vsyncpa [#allocation5], 0 }
   0x2   :  { %16 = vsyncpa [#allocation8], 0  ;;  %s1237_s30 = smov [#allocation4]   ;;  %s1238_s11 = smov [#allocation2]  }
   0x3   :  { %s36_s10 = sshll.u32 %s1237_s30, 4  ;;  %s24_s12 = sshll.u32 %s1238_s11, 4  ;;  %s37_s10 = int_to_ptr.vmem [resolvable:$true] %s36_s10  ;;  %s1300_s12 = int_to_ptr.vmem [resolvable:$true] %s24_s12 }
   0x4   :  { %s1143_s15 = scalar_lea.hbm %s1575_s2, 512 }
   0x5   :  { %p1144_p0 = scmp.ne.s32.totalorder %s1575_s2, %s1143_s15  ;;  %p1147_p1 = scmp.lt.u32.totalorder %s1143_s15, %s1575_s2 }
   0x7   :  { %p1149_p2 = pnand %p1147_p1, %p1144_p0 }
   0x9   :  { %1152 = shalt.err (!%p1149_p2)
}
   0xa   :  { %s1153_s20 = scalar_lea.vmem %s37_s10, 512  ;;  %p1158_p4 = scmp.lt.s32.totalorder %s37_s10, %s37_s10 }
   0xb   :  { %p1154_p3 = scmp.ne.s32.totalorder %s37_s10, %s1153_s20  ;;  %p1159_p5 = scmp.lt.s32.totalorder %s1153_s20, %s1153_s20 }
   0xd   :  { %p1160_p6 = por %p1159_p5, %p1158_p4 }
   0xf   :  { %p1161_p7 = pnand %p1160_p6, %p1154_p3 }
  0x11   :  { %1164 = shalt.err (!%p1161_p7)
}
  0x12   :  { %s1239_s21 = smov 64   ;;  %s1240_s22 = smov 4  }
  0x13   :  { %42 = dma.hbm_to_vmem [thread:$0]  %s1575_s2, 512, %s37_s10, [#allocation5], %s1239_s21, %s1239_s21, %s1240_s22  }
  0x14   :  { %s1165_s27 = scalar_lea.hbm %s1574_s1, 128 }
  0x15   :  { %p1166_p8 = scmp.ne.s32.totalorder %s1574_s1, %s1165_s27  ;;  %p1169_p9 = scmp.lt.u32.totalorder %s1165_s27, %s1574_s1 }
  0x17   :  { %p1171_p10 = pnand %p1169_p9, %p1166_p8 }
  0x19   :  { %1174 = shalt.err (!%p1171_p10)
}
  0x1a   :  { %s1175_s13 = scalar_lea.vmem %s1300_s12, 128  ;;  %p1180_p12 = scmp.lt.s32.totalorder %s1300_s12, %s1300_s12 }
  0x1b   :  { %p1176_p11 = scmp.ne.s32.totalorder %s1300_s12, %s1175_s13  ;;  %p1181_p13 = scmp.lt.s32.totalorder %s1175_s13, %s1175_s13 }
  0x1d   :  { %p1182_p0 = por %p1181_p13, %p1180_p12 }
  0x1f   :  { %p1183_p1 = pnand %p1182_p0, %p1176_p11 }
  0x21   :  { %1186 = shalt.err (!%p1183_p1)
}
  0x22   :  { %30 = dma.hbm_to_vmem [thread:$0]  %s1574_s1, 128, %s1300_s12, [#allocation3], %s1239_s21, %s1239_s21, %s1240_s22  }
  0x23   :  { %s1241_s14 = smov [#allocation6]   ;;  %s1242_s16 = smov [#allocation7]  }
  0x24   :  { %s48_s15 = sshll.u32 %s1241_s14, 4  ;;  %s69_s17 = sshll.u32 %s1242_s16, 4  ;;  %s49_s15 = int_to_ptr.vmem [resolvable:$true] %s48_s15  ;;  %s70_s17 = int_to_ptr.vmem [resolvable:$true] %s69_s17 }
  0x25   :  { %s1187_s20 = scalar_lea.hbm %s1576_s3, 512 }
  0x26   :  { %p1188_p2 = scmp.ne.s32.totalorder %s1576_s3, %s1187_s20  ;;  %p1191_p3 = scmp.lt.u32.totalorder %s1187_s20, %s1576_s3 }
  0x28   :  { %p1193_p4 = pnand %p1191_p3, %p1188_p2 }
  0x2a   :  { %1196 = shalt.err (!%p1193_p4)
}
  0x2b   :  { %s1197_s1 = scalar_lea.vmem %s49_s15, 512  ;;  %p1202_p6 = scmp.lt.s32.totalorder %s49_s15, %s49_s15 }
  0x2c   :  { %p1198_p5 = scmp.ne.s32.totalorder %s49_s15, %s1197_s1  ;;  %p1203_p7 = scmp.lt.s32.totalorder %s1197_s1, %s1197_s1 }
  0x2e   :  { %p1204_p8 = por %p1203_p7, %p1202_p6 }
  0x30   :  { %p1205_p9 = pnand %p1204_p8, %p1198_p5 }
  0x32   :  { %1208 = shalt.err (!%p1205_p9)
}
  0x33   :  { %54 = dma.hbm_to_vmem [thread:$0]  %s1576_s3, 512, %s49_s15, [#allocation5], %s1239_s21, %s1239_s21, %s1240_s22  }
  0x34   :  { %s1209_s30 = scalar_lea.hbm %s1581_s8, 256 }
  0x35   :  { %p1210_p10 = scmp.ne.s32.totalorder %s1581_s8, %s1209_s30  ;;  %p1213_p11 = scmp.lt.u32.totalorder %s1209_s30, %s1581_s8 }
  0x37   :  { %p1215_p12 = pnand %p1213_p11, %p1210_p10 }
  0x39   :  { %1218 = shalt.err (!%p1215_p12)
}
  0x3a   :  { %s1219_s14 = scalar_lea.vmem %s70_s17, 256  ;;  %p1224_p0 = scmp.lt.s32.totalorder %s70_s17, %s70_s17 }
  0x3b   :  { %p1220_p13 = scmp.ne.s32.totalorder %s70_s17, %s1219_s14  ;;  %p1225_p1 = scmp.lt.s32.totalorder %s1219_s14, %s1219_s14 }
  0x3d   :  { %p1226_p2 = por %p1225_p1, %p1224_p0 }
  0x3f   :  { %p1227_p3 = pnand %p1226_p2, %p1220_p13 }
  0x41   :  { %1230 = shalt.err (!%p1227_p3)
}
  0x42   :  { %72 = dma.hbm_to_vmem [thread:$0]  %s1581_s8, 256, %s70_s17, [#allocation8]  }
  0x43   :  { %1231 = dma.done.wait [#allocation3], 128  }
  0x44   :  { %1232 = vsyncadd [#allocation3], 4294967168 }
  0x45   :  { %1233 = dma.done.wait [#allocation5], 1024  }
  0x46   :  { %1234 = vsyncadd [#allocation5], 4294966272 }
  0x47   :  { %1235 = dma.done.wait [#allocation8], 256  }
  0x48   :  { %1236 = vsyncadd [#allocation8], 4294967040  ;;  %v1243_v0 = vmov 0   ;;  %v86_v1 = vld [vmem:[%s1573_s0] sm:$0xff]  ;;  %v1244_v4 = vmov 0.0   ;;  %v1245_v6 = vmov 1   ;;  %v90_v8 = vlaneseq }
  0x49   :  { %1084 = vset.pattern.permute.xlu0 %v1243_v0  ;;  %v1069_v2 = vtrunc.f32 %v86_v1  ;;  %988 = vmatprep.subr.bf16.mxu0 %v1244_v4  ;;  %v1086_v7 = vld [vmem:[#allocation2] sm:$0xff]   ;;  %vm1246_vm0 = vmmov 0   ;;  %vm113_vm3 = vcmask 130048   ;;  %v1087_v15 = vld [vmem:[#allocation4] sm:$0xff]   ;;  %v1088_v16 = vld [vmem:[#allocation4 + $0x8] sm:$0xff]   ;;  %s1247_s0 = smov 96  }
  0x4a   :  { %994 = vmatprep.subr.bf16.mxu1 %v1244_v4  ;;  %989 = vmatpush3.bf16.msra.mxu0 %v1086_v7  ;;  %v91_v9 = vand.u32 127, %v90_v8  ;;  %v1089_v17 = vld [vmem:[#allocation4 + $0x10] sm:$0xff]   ;;  %v1090_v18 = vld [vmem:[#allocation4 + $0x18] sm:$0xff]   ;;  %v1091_v20 = vld [vmem:[#allocation6] sm:$0xff]   ;;  %s1248_s8 = smov 30   ;;  %vm170_vm4 = vcmask 261120  }
  0x4b   :  { %v1070_v3 = vcvt.f32.s32 %v1069_v2  ;;  %1006 = vmatprep.subr.bf16.mxu0 %v1244_v4  ;;  %990 = vmatprep.mubr.msk.bf16.mxu0 %vm1246_vm0, %v1244_v4  ;;  %v1092_v23 = vld [vmem:[#allocation6 + $0x8] sm:$0xff]   ;;  %vm172_vm5 = vcmask 293888   ;;  %vm211_vm6 = vcmask 523264   ;;  %v1093_v33 = vld [vmem:[#allocation6 + $0x10] sm:$0xff]   ;;  %v1094_v34 = vld [vmem:[#allocation6 + $0x18] sm:$0xff]   ;;  %v1429_v47 = vshrl.u32 %v90_v8, 7 }
  0x4c   :  { %1002 = vmatprep.mubr.msk.bf16.mxu1 %vm1246_vm0, %v1244_v4  ;;  %vm92_vm1 = vcmp.lt.s32.totalorder %v91_v9, 7  ;;  %995 = vmatpush3.bf16.msra.mxu1 %v1087_v15  ;;  %v1095_v35 = vld [vmem:[%s1577_s4] ss:$8 sps:$4 sm:$0xff]   ;;  %v1097_v36 = vld [vmem:[%s1577_s4 + $0x4] ss:$8 sps:$4 sm:$0xff]   ;;  %v1126_v7 = vld [vmem:[%s1578_s5 + $0x18] sm:$0xff]  }
  0x4d   :  { %95 = vperm.xlu0 %1084, %v1070_v3   ;;  %v93_v5 = vadd.s32 7, %v1070_v3  ;;  %996 = vmatprep.subr.bf16.mxu1 %v1244_v4  ;;  %v1100_v37 = vld [vmem:[%s1577_s4 + $0x14] ss:$8 sps:$4 sm:$0xff]   ;;  %v1098_v38 = vld [vmem:[%s1577_s4 + $0x10] ss:$8 sps:$4 sm:$0xff]   ;;  %v185_v48 = vsub.s32 0, %v1429_v47 }
  0x4e   :  { %v1103_v39 = vld [vmem:[%s1577_s4 + $0x24] ss:$8 sps:$4 sm:$0xff]   ;;  %v1101_v40 = vld [vmem:[%s1577_s4 + $0x20] ss:$8 sps:$4 sm:$0xff]   ;;  %v1106_v41 = vld [vmem:[%s1577_s4 + $0x34] ss:$8 sps:$4 sm:$0xff]  }
  0x4f   :  { %v1104_v42 = vld [vmem:[%s1577_s4 + $0x30] ss:$8 sps:$4 sm:$0xff]   ;;  %v1109_v43 = vld [vmem:[%s1577_s4 + $0x44] ss:$8 sps:$4 sm:$0xff]   ;;  %v1107_v44 = vld [vmem:[%s1577_s4 + $0x40] ss:$8 sps:$4 sm:$0xff]  }
  0x50   :  { %997 = vmatpush3.bf16.msra.mxu1 %v1088_v16  ;;  %v1112_v45 = vld [vmem:[%s1577_s4 + $0x54] ss:$8 sps:$4 sm:$0xff]   ;;  %v1110_v46 = vld [vmem:[%s1577_s4 + $0x50] ss:$8 sps:$4 sm:$0xff]   ;;  %v1432_v49 = vld [vmem:[#allocation7] sm:$0xff]  ;;  %vm872_vm13 = vcmask 785408  }
  0x51   :  { %1085 = vset.pattern.permute.xlu0 %v1245_v6  ;;  %998 = vmatprep.subr.bf16.mxu1 %v1244_v4  ;;  %v186_v50 = vrot.slane %v1432_v49, %v185_v48  ;;  %v1115_v59 = vld [vmem:[%s1577_s4 + $0x64] ss:$8 sps:$4 sm:$0xff]   ;;  %v1113_v60 = vld [vmem:[%s1577_s4 + $0x60] ss:$8 sps:$4 sm:$0xff]   ;;  %v1118_v61 = vld [vmem:[%s1577_s4 + $0x74] ss:$8 sps:$4 sm:$0xff]  }
  0x52   :  { %98 = vperm.xlu0 %1085, %v93_v5   ;;  %v1116_v62 = vld [vmem:[%s1577_s4 + $0x70] ss:$8 sps:$4 sm:$0xff]   ;;  %v1119_v63 = vld [vmem:[%s1578_s5 + $0x40] sm:$0xff]   ;;  %v1122_v2 = vld [vmem:[%s1578_s5 + $0x8] sm:$0xff]  }
  0x53   :  { %v1123_v3 = vld [vmem:[%s1578_s5 + $0x50] sm:$0xff]   ;;  %v1125_v6 = vld [vmem:[%s1578_s5 + $0x58] sm:$0xff]   ;;  %v1127_v8 = vld [vmem:[%s1578_s5 + $0x60] sm:$0xff]  }
  0x54   :  { %999 = vmatpush3.bf16.msra.mxu1 %v1089_v17  ;;  %v1124_v5 = vld [vmem:[%s1578_s5 + $0x10] sm:$0xff]  }
  0x55   :  { %1000 = vmatprep.subr.bf16.mxu1 %v1244_v4 }
  0x58   :  { %1001 = vmatpush3.bf16.msra.mxu1 %v1090_v18 }
  0x59   :  { %446 = vmatprep.subr.bf16.mxu1 %v1097_v36 }
  0xcc   :  { %v96_v10 = vpop.permute.xlu0 %95 }
  0xd1   :  { %v99_v11 = vpop.permute.xlu0 %98 }
  0xd2   :  { %v100_v12 = vsel %vm92_vm1, %v96_v10, %v99_v11  ;;  %v1129_v10 = vld [vmem:[%s1578_s5 + $0x68] sm:$0xff]  }
  0xd3   :  { %vm101_vm2 = vcmp.eq.s32.totalorder %v91_v9, %v100_v12  ;;  %v1128_v9 = vld [vmem:[%s1578_s5 + $0x20] sm:$0xff]   ;;  %v1130_v11 = vld [vmem:[%s1578_s5 + $0x28] sm:$0xff]   ;;  %v269_v12 = vsub.s32 1, %v1429_v47 }
  0xd4   :  { %v882_v13 = vsel %vm101_vm2, 1.0, %v1244_v4 }
  0xd5   :  { %v104_v14 = vpack.c.bf16 %v882_v13, %v882_v13  ;;  %v270_v13 = vrot.slane %v1432_v49, %v269_v12 }
  0xd7   :  { %991 = vmatmul.mubr.msk.bf16.vlgmr.msra.gmra.mrb[0].mxu0 %vm113_vm3, %v104_v14 }
  0xd8   :  { %1014 = vmatprep.mubr.msk.bf16.mxu0 %vm1246_vm0, %v1244_v4  ;;  %1007 = vmatpush3.bf16.msra.mxu0 %v1091_v20 }
  0xd9   :  { %1008 = vmatprep.subr.bf16.mxu0 %v1244_v4 }
  0xdc   :  { %1009 = vmatpush3.bf16.msra.mxu0 %v1092_v23  ;;  %v1132_v23 = vld [vmem:[%s1578_s5 + $0x30] sm:$0xff]  }
  0xdd   :  { %1010 = vmatprep.subr.bf16.mxu0 %v1244_v4 }
  0xe0   :  { %1011 = vmatpush3.bf16.msra.mxu0 %v1093_v33  ;;  %v88_v33 = vld [vmem:[#allocation7 + $0x8] sm:$0xff] }
  0xe1   :  { %1012 = vmatprep.subr.bf16.mxu0 %v1244_v4 }
  0xe4   :  { %1013 = vmatpush3.bf16.msra.mxu0 %v1094_v34 }
  0xe5   :  { %948 = vmatprep.subr.bf16.mxu0 %v1119_v63 }
 0x1aa   :  { %v151_v19 = vpop.f32.mrb[0].mxu0 }
 0x1ab   :  { %158 = vrot.lane.b32.xlu1 %v151_v19, %s1247_s0  ;;  %v992_v21 = vpop.f32.mrb[1].mxu0 }
 0x1ac   :  { %v154_v22 = vpop.f32.mrb[2].mxu0 }
 0x1ad   :  { %v993_v24 = vpop.f32.mrb[3].mxu0  ;;  %v1131_v22 = vld [vmem:[%s1578_s5 + $0x70] sm:$0xff]  }
 0x1ae   :  { %v1133_v24 = vld [vmem:[%s1578_s5 + $0x78] sm:$0xff]  }
 0x1af   :  { %162 = vrot.lane.b32.xlu1 %v151_v19, %s1239_s21 }
 0x1b3   :  { %167 = vrot.lane.b32.xlu1 %v86_v1, %s1248_s8  ;;  %v1121_v1 = vld [vmem:[%s1578_s5 + $0x48] sm:$0xff]  }
 0x21d   :  { %v159_v25 = vpop.permute.xlu1 %158 }
 0x21e   :  { %v161_v27 = vadd.f32 %v159_v25, %v151_v19  ;;  %v1134_v25 = vld [vmem:[%s1578_s5 + $0x38] sm:$0xff]  }
 0x221   :  { %v163_v26 = vpop.permute.xlu1 %162 }
 0x222   :  { %v165_v28 = vadd.f32 %v163_v26, %v161_v27  ;;  %v1135_v26 = vld [vmem:[%s1579_s6] sm:$0xff]   ;;  %v1136_v27 = vld [vmem:[%s1579_s6 + $0x8] sm:$0xff]  }
 0x225   :  { %v168_v29 = vpop.permute.xlu1 %167 }
 0x226   :  { %v171_v30 = vsel %vm170_vm4, %v165_v28, %v168_v29  ;;  %v1137_v28 = vld [vmem:[%s1579_s6 + $0x10] sm:$0xff]   ;;  %v1138_v29 = vld [vmem:[%s1579_s6 + $0x18] sm:$0xff]  }
 0x227   :  { %v1385_v31 = vsel %vm172_vm5, %v171_v30, 0.0  ;;  %v1139_v30 = vld [vmem:[%s1579_s6 + $0x20] sm:$0xff]  }
 0x228   :  { %v174_v32 = vpack.c.bf16 %v1385_v31, %v1385_v31 }
 0x22a   :  { %1003 = vmatmul.mubr.msk.bf16.vlgmr.msra.gmra.mrb[0].mxu1 %vm211_vm6, %v174_v32  ;;  %v360_v32 = vsub.s32 2, %v1429_v47 }
 0x22b   :  { %478 = vmatprep.mubr.bf16.mxu1 %v1243_v0  ;;  %447 = vmatpush1.bf16.msra.mxu1 %v1095_v35  ;;  %v1120_v0 = vld [vmem:[%s1578_s5] sm:$0xff]  }
 0x22c   :  { %448 = vmatprep.subr.bf16.mxu1 %v1100_v37  ;;  %v361_v34 = vrot.slane %v1432_v49, %v360_v32  ;;  %v365_v35 = vrot.slane %v88_v33, %v360_v32 }
 0x22f   :  { %449 = vmatpush1.bf16.msra.mxu1 %v1098_v38 }
 0x230   :  { %450 = vmatprep.subr.bf16.mxu1 %v1103_v39 }
 0x233   :  { %451 = vmatpush1.bf16.msra.mxu1 %v1101_v40 }
 0x234   :  { %452 = vmatprep.subr.bf16.mxu1 %v1106_v41 }
 0x237   :  { %453 = vmatpush1.bf16.msra.mxu1 %v1104_v42 }
 0x238   :  { %454 = vmatprep.subr.bf16.mxu1 %v1109_v43 }
 0x23b   :  { %455 = vmatpush1.bf16.msra.mxu1 %v1107_v44 }
 0x23c   :  { %456 = vmatprep.subr.bf16.mxu1 %v1112_v45 }
 0x23f   :  { %457 = vmatpush1.bf16.msra.mxu1 %v1110_v46 }
 0x240   :  { %458 = vmatprep.subr.bf16.mxu1 %v1115_v59  ;;  %v786_v59 = vld [vmem:[%s1580_s7 + $0x20] sm:$0xff] }
 0x243   :  { %459 = vmatpush1.bf16.msra.mxu1 %v1113_v60  ;;  %v787_v60 = vld [vmem:[%s1580_s7 + $0x28] sm:$0xff] }
 0x244   :  { %460 = vmatprep.subr.bf16.mxu1 %v1118_v61  ;;  %v1064_v61 = vpack.c.bf16 %v787_v60, %v786_v59 }
 0x247   :  { %461 = vmatpush1.bf16.msra.mxu1 %v1116_v62  ;;  %v529_v62 = vsub.s32 3, %v1429_v47 }
 0x248   :  { %1018 = vmatprep.subr.bf16.mxu1 %v1244_v4 }
 0x2fd   :  { %v249_v51 = vpop.f32.mrb[0].mxu1 }
 0x2fe   :  { %v250_v52 = vadd.f32 %v249_v51, %v186_v50  ;;  %v1004_v53 = vpop.f32.mrb[1].mxu1  ;;  %v1140_v50 = vld [vmem:[%s1579_s6 + $0x28] sm:$0xff]   ;;  %v1141_v51 = vld [vmem:[%s1579_s6 + $0x30] sm:$0xff]  }
 0x2ff   :  { %v252_v54 = vpop.f32.mrb[2].mxu1  ;;  %v782_v53 = vld [vmem:[%s1580_s7] sm:$0xff] }
 0x300   :  { %vm255_vm7 = vcmp.ge.f32.partialorder %v250_v52, 0.0  ;;  %v256_v55 = vmul.f32 0.1, %v250_v52  ;;  %v1005_v56 = vpop.f32.mrb[3].mxu1  ;;  %v783_v54 = vld [vmem:[%s1580_s7 + $0x8] sm:$0xff] }
 0x301   :  { %v1249_v56 = vmov 0.0|0.0  }
 0x302   :  { %v257_v57 = vsel %vm255_vm7, %v250_v52, %v256_v55  ;;  %v1142_v52 = vld [vmem:[%s1579_s6 + $0x38] sm:$0xff]   ;;  %v784_v55 = vld [vmem:[%s1580_s7 + $0x10] sm:$0xff] }
 0x303   :  { %v258_v58 = vpack.c.bf16 %v257_v57, %v257_v57  ;;  %v785_v57 = vld [vmem:[%s1580_s7 + $0x18] sm:$0xff] }
 0x305   :  { %1015 = vmatmul.mubr.msk.bf16.vlgmr.msra.gmra.mrb[4].mxu0 %vm211_vm6, %v258_v58  ;;  %v1061_v58 = vpack.c.bf16 %v785_v57, %v784_v55 }
 0x306   :  { %949 = vmatpush3.bf16.msra.mxu0 %v1120_v0  ;;  %v530_v0 = vrot.slane %v1432_v49, %v529_v62 }
 0x307   :  { %950 = vmatprep.subr.bf16.mxu0 %v1121_v1 }
 0x30a   :  { %951 = vmatpush3.bf16.msra.mxu0 %v1122_v2 }
 0x30b   :  { %952 = vmatprep.subr.bf16.mxu0 %v1123_v3 }
 0x30e   :  { %953 = vmatpush3.bf16.msra.mxu0 %v1124_v5 }
 0x30f   :  { %954 = vmatprep.subr.bf16.mxu0 %v1125_v6 }
 0x312   :  { %955 = vmatpush3.bf16.msra.mxu0 %v1126_v7 }
 0x313   :  { %956 = vmatprep.subr.bf16.mxu0 %v1127_v8 }
 0x316   :  { %957 = vmatpush3.bf16.msra.mxu0 %v1128_v9 }
 0x317   :  { %958 = vmatprep.subr.bf16.mxu0 %v1129_v10  ;;  %v788_v10 = vld [vmem:[%s1580_s7 + $0x30] sm:$0xff] }
 0x31a   :  { %959 = vmatpush3.bf16.msra.mxu0 %v1130_v11  ;;  %v789_v11 = vld [vmem:[%s1580_s7 + $0x38] sm:$0xff] }
 0x31b   :  { %960 = vmatprep.subr.bf16.mxu0 %v1131_v22  ;;  %v1067_v12 = vpack.c.bf16 %v789_v11, %v788_v10  ;;  %v792_v22 = vsub.s32 5, %v1429_v47 }
 0x31e   :  { %961 = vmatpush3.bf16.msra.mxu0 %v1132_v23  ;;  %v793_v23 = vrot.slane %v1432_v49, %v792_v22 }
 0x31f   :  { %962 = vmatprep.subr.bf16.mxu0 %v1133_v24 }
 0x322   :  { %963 = vmatpush3.bf16.msra.mxu0 %v1134_v25 }
 0x323   :  { %1057 = vmatprep.subr.bf16.mxu0 %v1249_v56 }
 0x3d8   :  { %v332_v14 = vpop.f32.mrb[4].mxu0 }
 0x3d9   :  { %v333_v15 = vadd.f32 %v332_v14, %v270_v13  ;;  %v1016_v16 = vpop.f32.mrb[5].mxu0  ;;  %v689_v13 = vsub.s32 4, %v1429_v47 }
 0x3da   :  { %v335_v17 = vpop.f32.mrb[6].mxu0 }
 0x3db   :  { %vm338_vm8 = vcmp.ge.f32.partialorder %v333_v15, 0.0  ;;  %v339_v18 = vmul.f32 0.1, %v333_v15  ;;  %v1017_v19 = vpop.f32.mrb[7].mxu0  ;;  %v690_v14 = vrot.slane %v1432_v49, %v689_v13 }
 0x3dd   :  { %v340_v20 = vsel %vm338_vm8, %v333_v15, %v339_v18 }
 0x3de   :  { %v341_v21 = vpack.c.bf16 %v340_v20, %v340_v20 }
 0x3e0   :  { %479 = vmatmul.mubr.bf16.vlgmr.msra.gmra.mrb[4].mxu1 %v341_v21 }
 0x3e1   :  { %1034 = vmatprep.mubr.msk.bf16.mxu1 %vm1246_vm0, %v1244_v4  ;;  %1019 = vmatpush3.bf16.msra.mxu1 %v1135_v26 }
 0x3e2   :  { %1020 = vmatprep.subr.bf16.mxu1 %v1244_v4 }
 0x3e5   :  { %1021 = vmatpush3.bf16.msra.mxu1 %v1136_v27 }
 0x3e6   :  { %1022 = vmatprep.subr.bf16.mxu1 %v1244_v4 }
 0x3e9   :  { %1023 = vmatpush3.bf16.msra.mxu1 %v1137_v28 }
 0x3ea   :  { %1024 = vmatprep.subr.bf16.mxu1 %v1244_v4 }
 0x3ed   :  { %1025 = vmatpush3.bf16.msra.mxu1 %v1138_v29 }
 0x3ee   :  { %1026 = vmatprep.subr.bf16.mxu1 %v1244_v4 }
 0x3f1   :  { %1027 = vmatpush3.bf16.msra.mxu1 %v1139_v30 }
 0x3f2   :  { %1028 = vmatprep.subr.bf16.mxu1 %v1244_v4 }
 0x3f5   :  { %1029 = vmatpush3.bf16.msra.mxu1 %v1140_v50 }
 0x3f6   :  { %1030 = vmatprep.subr.bf16.mxu1 %v1244_v4 }
 0x3f9   :  { %1031 = vmatpush3.bf16.msra.mxu1 %v1141_v51 }
 0x3fa   :  { %1032 = vmatprep.subr.bf16.mxu1 %v1244_v4 }
 0x3fd   :  { %1033 = vmatpush3.bf16.msra.mxu1 %v1142_v52 }
 0x4b3   :  { %v480_v36 = vpop.f32.mrb[4].mxu1 }
 0x4b4   :  { %v481_v37 = vadd.f32 %v480_v36, %v361_v34  ;;  %v482_v38 = vpop.f32.mrb[5].mxu1 }
 0x4b5   :  { %v483_v39 = vadd.f32 %v482_v38, %v365_v35  ;;  %v484_v40 = vpop.f32.mrb[6].mxu1 }
 0x4b6   :  { %vm487_vm9 = vcmp.ge.f32.partialorder %v481_v37, 0.0  ;;  %v489_v41 = vmul.f32 0.1, %v481_v37  ;;  %v485_v42 = vpop.f32.mrb[7].mxu1 }
 0x4b7   :  { %vm488_vm10 = vcmp.ge.f32.partialorder %v483_v39, 0.0  ;;  %v490_v43 = vmul.f32 0.1, %v483_v39 }
 0x4b8   :  { %v491_v44 = vsel %vm487_vm9, %v481_v37, %v489_v41 }
 0x4b9   :  { %v492_v45 = vsel %vm488_vm10, %v483_v39, %v490_v43  ;;  %v493_v48 = vpack.c.bf16 %v491_v44, %v491_v44 }
 0x4ba   :  { %v494_v46 = vpack.c.bf16 %v492_v45, %v492_v45 }
 0x4bc   :  { %659 = vmatprep.mubr.bf16.mxu0 %v494_v46 }
 0x4bd   :  { %660 = vmatmul.mubr.bf16.vlgmr.msra.gmra.mrb[8].mxu0 %v493_v48 }
 0x4be   :  { %1054 = vmatprep.mubr.msk.f32.mxu0 %vm1246_vm0, %v1244_v4  ;;  %v1058_v4 = vpack.c.bf16 %v783_v54, %v782_v53 }
 0x4c0   :  { %1059 = vmatpush3.bf16.msra.mxu0 %v1058_v4 }
 0x4c1   :  { %1060 = vmatprep.subr.bf16.mxu0 %v1249_v56 }
 0x4c4   :  { %1062 = vmatpush3.bf16.msra.mxu0 %v1061_v58 }
 0x4c5   :  { %1063 = vmatprep.subr.bf16.mxu0 %v1249_v56 }
 0x4c8   :  { %1065 = vmatpush3.bf16.msra.mxu0 %v1064_v61 }
 0x4c9   :  { %1066 = vmatprep.subr.bf16.mxu0 %v1249_v56 }
 0x4cc   :  { %1068 = vmatpush3.bf16.msra.mxu0 %v1067_v12 }
 0x590   :  { %v964_v63 = vpop.f32.mrb[8].mxu0 }
 0x591   :  { %v965_v1 = vpop.f32.mrb[9].mxu0 }
 0x592   :  { %v966_v2 = vadd.f32 %v965_v1, %v964_v63  ;;  %v967_v3 = vpop.f32.mrb[10].mxu0 }
 0x593   :  { %v968_v5 = vpop.f32.mrb[11].mxu0 }
 0x594   :  { %v662_v6 = vadd.f32 %v966_v2, %v530_v0 }
 0x596   :  { %vm667_vm11 = vcmp.ge.f32.partialorder %v662_v6, 0.0  ;;  %v668_v7 = vmul.f32 0.1, %v662_v6 }
 0x598   :  { %v669_v8 = vsel %vm667_vm11, %v662_v6, %v668_v7 }
 0x599   :  { %v670_v9 = vpack.c.bf16 %v669_v8, %v669_v8 }
 0x59b   :  { %1035 = vmatmul.mubr.bf16.vlgmr.msra.gmra.mrb[8].mxu1 %v670_v9 }
 0x66e   :  { %v773_v15 = vpop.f32.mrb[8].mxu1 }
 0x66f   :  { %v774_v16 = vadd.f32 %v773_v15, %v690_v14  ;;  %v1036_v17 = vpop.f32.mrb[9].mxu1 }
 0x670   :  { %v776_v18 = vpop.f32.mrb[10].mxu1 }
 0x671   :  { %vm779_vm12 = vcmp.ge.f32.partialorder %v774_v16, 0.0  ;;  %v780_v19 = vmul.f32 0.1, %v774_v16  ;;  %v1037_v20 = vpop.f32.mrb[11].mxu1 }
 0x673   :  { %v781_v21 = vsel %vm779_vm12, %v774_v16, %v780_v19 }
 0x674   :  { %1055 = vmatmul.mubr.msk.f32.vlgmr.msra.gmra.mrb[12].mxu0 %vm211_vm6, %v781_v21 }
 0x747   :  { %v863_v24 = vpop.f32.mrb[12].mxu0 }
 0x748   :  { %v864_v25 = vadd.f32 %v863_v24, %v793_v23  ;;  %v1056_v26 = vpop.f32.mrb[13].mxu0 }
 0x74a   :  { %868 = vrot.lane.b32.xlu0 %v864_v25, %s1239_s21 }
 0x7bc   :  { %v869_v27 = vpop.permute.xlu0 %868 }
 0x7bd   :  { %v871_v28 = vsel %vm211_vm6, %v1385_v31, %v869_v27 }
 0x7be   :  { %v873_v29 = vsel %vm872_vm13, %v871_v28, 0.0 }
 0x7bf   :  { %874 = vst [vmem:[%s1582_s9] sm:$0xff] %v873_v29 }
 0x7c0   :  { %879 = vsyncpa [#allocation3], 1 }
 0x7c1   :  { %880 = vsyncpa [#allocation5], 1 }
 0x7c2   :  { %881 = vsyncpa [#allocation8], 1 }

</bundles_post_ra>
